<compile_context>
chip_gen: v6e
topology: v6e:2x2x1
jax: 0.10.0
libtpu: 0.0.40
codegen_flags: <defaults>
</compile_context>

<pallas_src>
import jax
import jax.numpy as jnp
from jax.experimental import pallas as pl
from jax.experimental.pallas import tpu as pltpu

LANE = 128  # TPU lane width


def _round_up(n, m):
    return ((n + m - 1) // m) * m


def net_kernel(x_ref, w1_ref, b1_ref, w2_ref, b2_ref, o_ref):
    """Fused MLP + per-problem Softmax(dim=0) for T problems per grid step.

    Shapes inside the kernel:
      x : (T, B, D_in)   w1: (D_in, Hp)   b1: (1, Hp)
      w2: (Hp, D_out)    b2: (1, D_out)   o : (T, B, D_out)
    """
    t, b, d_in = x_ref.shape

    # Flatten (T, B) -> rows so both matmuls run as ONE MXU call with M = T*B.
    x2 = x_ref[...].reshape(t * b, d_in)

    # Linear 1 + ReLU (MXU, f32 accumulation)
    h = jnp.dot(x2, w1_ref[...], preferred_element_type=jnp.float32) + b1_ref[...]
    h = jnp.maximum(h, 0.0)

    # Linear 2
    logits = jnp.dot(h, w2_ref[...], preferred_element_type=jnp.float32) + b2_ref[...]
    logits = logits.reshape(t, b, -1)

    # Softmax over dim=0 of each problem (its batch axis) == axis=1 here.
    # Each problem's full batch is in this block, so the reduction is exact.
    m = jnp.max(logits, axis=1, keepdims=True)
    e = jnp.exp(logits - m)
    s = jnp.sum(e, axis=1, keepdims=True)
    o_ref[...] = (e / s).astype(o_ref.dtype)


def prepare_params(w1, b1, w2, b2):
    """One-time (init-time) weight prep: zero-pad the hidden axis to lane width.

    Exact: padded hidden units produce 0 after ReLU and multiply zero rows of
    w2, so they contribute nothing.  Call this ONCE, outside the hot path.
    """
    hidden = w1.shape[1]
    hp = _round_up(hidden, LANE)
    w1p = jnp.pad(w1, ((0, 0), (0, hp - hidden)))
    b1p = jnp.pad(b1.reshape(1, hidden), ((0, 0), (0, hp - hidden)))
    w2p = jnp.pad(w2, ((0, hp - hidden), (0, 0)))
    b2p = b2.reshape(1, -1)
    return w1p, b1p, w2p, b2p


def _choose_t(n, b, target_rows):
    """Problems per grid step: fill the MXU M dim, keep grid >= 2, divide N."""
    t = max(1, min(target_rows // max(b, 1), n))
    if n >= 2:
        t = min(t, -(-n // 2))  # grid length >= 2 so both v7x TCs get work
    while n % t != 0:           # avoid a ragged last block
        t -= 1
    return t


def net_forward_many(xs, w1p, b1p, w2p, b2p, *, target_rows=256):
    """N independent forward passes fused into one pallas_call.

    xs: (N, B, D_in); padded params from prepare_params.  Returns (N, B, D_out)
    with softmax taken over each problem's own batch axis (dim=0), identical
    to N separate calls of the original module.
    target_rows ~ 256 for v6e/v7x (2x256^2 MXU); 128 already fills v5e.
    """
    N, B, d_in = xs.shape
    d_out = w2p.shape[1]
    T = _choose_t(N, B, target_rows)

    vmem = pltpu.MemorySpace.VMEM
    return pl.pallas_call(
        net_kernel,
        out_shape=jax.ShapeDtypeStruct((N, B, d_out), jnp.float32),
        grid=(N // T,),
        in_specs=[
            # T problems' activations per grid step.
            pl.BlockSpec((T, B, d_in), lambda i: (i, 0, 0), memory_space=vmem),
            # Weights/biases: same (full) block every grid step -> resident.
            pl.BlockSpec(w1p.shape, lambda i: (0, 0), memory_space=vmem),
            pl.BlockSpec(b1p.shape, lambda i: (0, 0), memory_space=vmem),
            pl.BlockSpec(w2p.shape, lambda i: (0, 0), memory_space=vmem),
            pl.BlockSpec(b2p.shape, lambda i: (0, 0), memory_space=vmem),
        ],
        # Compact output (no lane padding): avoids 32x HBM write amplification
        # and the wrapper slice; the d_out=4 masked store is the cheaper trade.
        out_specs=pl.BlockSpec((T, B, d_out), lambda i: (i, 0, 0), memory_space=vmem),
        compiler_params=pltpu.CompilerParams(
            dimension_semantics=("parallel",),   # shards grid steps across v7x TCs
            vmem_limit_bytes=32 * 1024 * 1024,   # headroom for larger T; tiny today
        ),
    )(xs, w1p, b1p, w2p, b2p)


def net_forward(x, w1p, b1p, w2p, b2p):
    """Single forward pass, matching Net.forward(x) with x: (B, D_in)."""
    return net_forward_many(x[None], w1p, b1p, w2p, b2p)[0]


def _torch_like_linear_init(key, fan_in, fan_out):
    """Deterministic init mimicking nn.Linear default: U(-1/sqrt(fan_in), +)."""
    kw, kb = jax.random.split(key)
    bound = 1.0 / jnp.sqrt(jnp.float32(fan_in))
    # Stored already transposed: (in_features, out_features)
    w = jax.random.uniform(kw, (fan_in, fan_out), jnp.float32, -bound, bound)
    b = jax.random.uniform(kb, (fan_out,), jnp.float32, -bound, bound)
    return w, b


if __name__ == "__main__":
    # Shapes implied by the module: batch=8, input=16, hidden=32, output=4
    batch, input_size, hidden_size, output_size = 8, 16, 32, 4
    n_problems = 64  # multi-problem variant: T=32 per grid step, grid=(2,)

    root = jax.random.PRNGKey(0)
    kx, kxs, k1, k2 = jax.random.split(root, 4)

    x = jax.random.normal(kx, (batch, input_size), jnp.float32)
    xs = jax.random.normal(kxs, (n_problems, batch, input_size), jnp.float32)
    w1, b1 = _torch_like_linear_init(k1, input_size, hidden_size)
    w2, b2 = _torch_like_linear_init(k2, hidden_size, output_size)

    # Weight padding happens ONCE here, not per forward call.
    params = prepare_params(w1, b1, w2, b2)

    out = jax.block_until_ready(net_forward(x, *params))
    outs = jax.block_until_ready(net_forward_many(xs, *params))

    # Reference check in plain JAX (same math, same axis conventions).
    def ref_forward(xi):
        h = jnp.maximum(xi @ w1 + b1, 0.0)
        return jax.nn.softmax(h @ w2 + b2, axis=0)  # softmax over the batch axis

    ref = ref_forward(x)
    refs = jax.vmap(ref_forward)(xs)

    assert out.shape == (batch, output_size)
    assert outs.shape == (n_problems, batch, output_size)
    assert jnp.allclose(out, ref, atol=1e-5, rtol=1e-5), "single-problem mismatch"
    assert jnp.allclose(outs, refs, atol=1e-5, rtol=1e-5), "multi-problem mismatch"

    print("KERNEL_OK")
</pallas_src>

<mosaic_0001>
module attributes {stable_mosaic.version = 11 : i64} {
  func.func @net_kernel(%arg0: i32, %arg1: memref<1x8x16xf32, #tpu.memory_space<vmem>>, %arg2: memref<16x128xf32, #tpu.memory_space<vmem>>, %arg3: memref<1x128xf32, #tpu.memory_space<vmem>>, %arg4: memref<128x4xf32, #tpu.memory_space<vmem>>, %arg5: memref<1x4xf32, #tpu.memory_space<vmem>>, %arg6: memref<1x8x4xf32, #tpu.memory_space<vmem>>) attributes {dimension_semantics = [#tpu.dimension_semantics<parallel>], iteration_bounds = array<i64: 1>, scalar_prefetch = 0 : i64, scratch_operands = 0 : i64, tpu.core_type = #tpu.core_type<tc>, window_params = [{transform_indices = @transform_0, window_bounds = array<i64: 1, 8, 16>}, {pipeline_mode = #tpu.pipeline_mode<synchronous>, transform_indices = @transform_1, window_bounds = array<i64: 16, 128>}, {pipeline_mode = #tpu.pipeline_mode<synchronous>, transform_indices = @transform_2, window_bounds = array<i64: 1, 128>}, {pipeline_mode = #tpu.pipeline_mode<synchronous>, transform_indices = @transform_3, window_bounds = array<i64: 128, 4>}, {pipeline_mode = #tpu.pipeline_mode<synchronous>, transform_indices = @transform_4, window_bounds = array<i64: 1, 4>}, {transform_indices = @transform_5, window_bounds = array<i64: 1, 8, 4>}]} {
    %c0 = arith.constant 0 : index
    %c0_0 = arith.constant 0 : index
    %c0_1 = arith.constant 0 : index
    %0 = vector.load %arg1[%c0, %c0_0, %c0_1] : memref<1x8x16xf32, #tpu.memory_space<vmem>>, vector<1x8x16xf32>
    %1 = vector.shape_cast %0 : vector<1x8x16xf32> to vector<8x16xf32>
    %c0_2 = arith.constant 0 : index
    %c0_3 = arith.constant 0 : index
    %2 = vector.load %arg2[%c0_2, %c0_3] : memref<16x128xf32, #tpu.memory_space<vmem>>, vector<16x128xf32>
    %cst = arith.constant dense<0.000000e+00> : vector<8x128xf32>
    %3 = tpu.matmul %1, %2, %cst {dimension_numbers = #tpu.dot_dimension_numbers<[1], [0], [0], [1], [0, 0, 1, 1], [], []>} : vector<8x16xf32>, vector<16x128xf32>, vector<8x128xf32> -> vector<8x128xf32>
    %c0_4 = arith.constant 0 : index
    %c0_5 = arith.constant 0 : index
    %4 = vector.load %arg3[%c0_4, %c0_5] : memref<1x128xf32, #tpu.memory_space<vmem>>, vector<1x128xf32>
    %5 = vector.broadcast %4 : vector<1x128xf32> to vector<8x128xf32>
    %6 = arith.addf %3, %5 : vector<8x128xf32>
    %cst_6 = arith.constant 0.000000e+00 : f32
    %7 = vector.broadcast %cst_6 : f32 to vector<8x128xf32>
    %8 = arith.maximumf %6, %7 : vector<8x128xf32>
    %c0_7 = arith.constant 0 : index
    %c0_8 = arith.constant 0 : index
    %9 = vector.load %arg4[%c0_7, %c0_8] : memref<128x4xf32, #tpu.memory_space<vmem>>, vector<128x4xf32>
    %cst_9 = arith.constant dense<0.000000e+00> : vector<8x4xf32>
    %10 = tpu.matmul %8, %9, %cst_9 {dimension_numbers = #tpu.dot_dimension_numbers<[1], [0], [0], [1], [0, 0, 1, 1], [], []>} : vector<8x128xf32>, vector<128x4xf32>, vector<8x4xf32> -> vector<8x4xf32>
    %c0_10 = arith.constant 0 : index
    %c0_11 = arith.constant 0 : index
    %11 = vector.load %arg5[%c0_10, %c0_11] : memref<1x4xf32, #tpu.memory_space<vmem>>, vector<1x4xf32>
    %12 = vector.broadcast %11 : vector<1x4xf32> to vector<8x4xf32>
    %13 = arith.addf %10, %12 : vector<8x4xf32>
    %14 = vector.shape_cast %13 : vector<8x4xf32> to vector<1x8x4xf32>
    %cst_12 = arith.constant dense<0xFF800000> : vector<1x4xf32>
    %15 = vector.multi_reduction <maximumf>, %14, %cst_12 [1] : vector<1x8x4xf32> to vector<1x4xf32>
    %16 = vector.shape_cast %15 : vector<1x4xf32> to vector<1x1x4xf32>
    %17 = vector.broadcast %16 : vector<1x1x4xf32> to vector<1x8x4xf32>
    %18 = arith.subf %14, %17 : vector<1x8x4xf32>
    %19 = math.exp %18 : vector<1x8x4xf32>
    %cst_13 = arith.constant dense<0.000000e+00> : vector<1x4xf32>
    %20 = vector.multi_reduction <add>, %19, %cst_13 [1] : vector<1x8x4xf32> to vector<1x4xf32>
    %21 = vector.shape_cast %20 : vector<1x4xf32> to vector<1x1x4xf32>
    %22 = vector.broadcast %21 : vector<1x1x4xf32> to vector<1x8x4xf32>
    %23 = arith.divf %19, %22 : vector<1x8x4xf32>
    %c0_14 = arith.constant 0 : index
    %c0_15 = arith.constant 0 : index
    %c0_16 = arith.constant 0 : index
    %24 = vector.load %arg6[%c0_14, %c0_15, %c0_16] : memref<1x8x4xf32, #tpu.memory_space<vmem>>, vector<1x8x4xf32>
    tpu.vector_store %arg6[%c0_14, %c0_15, %c0_16], %23 {strides = array<i32>} : memref<1x8x4xf32, #tpu.memory_space<vmem>>, vector<1x8x4xf32>,
    return
  }
  func.func @transform_0(%arg0: i32) -> (i32, i32, i32) {
    %c0_i32 = arith.constant 0 : i32
    %c0_i32_0 = arith.constant 0 : i32
    %c0_i32_1 = arith.constant 0 : i32
    return %arg0, %c0_i32, %c0_i32_0 : i32, i32, i32
  }
  func.func @transform_1(%arg0: i32) -> (i32, i32) {
    %c0_i32 = arith.constant 0 : i32
    %c0_i32_0 = arith.constant 0 : i32
    %c0_i32_1 = arith.constant 0 : i32
    return %c0_i32, %c0_i32_0 : i32, i32
  }
  func.func @transform_2(%arg0: i32) -> (i32, i32) {
    %c0_i32 = arith.constant 0 : i32
    %c0_i32_0 = arith.constant 0 : i32
    %c0_i32_1 = arith.constant 0 : i32
    return %c0_i32, %c0_i32_0 : i32, i32
  }
  func.func @transform_3(%arg0: i32) -> (i32, i32) {
    %c0_i32 = arith.constant 0 : i32
    %c0_i32_0 = arith.constant 0 : i32
    %c0_i32_1 = arith.constant 0 : i32
    return %c0_i32, %c0_i32_0 : i32, i32
  }
  func.func @transform_4(%arg0: i32) -> (i32, i32) {
    %c0_i32 = arith.constant 0 : i32
    %c0_i32_0 = arith.constant 0 : i32
    %c0_i32_1 = arith.constant 0 : i32
    return %c0_i32, %c0_i32_0 : i32, i32
  }
  func.func @transform_5(%arg0: i32) -> (i32, i32, i32) {
    %c0_i32 = arith.constant 0 : i32
    %c0_i32_0 = arith.constant 0 : i32
    %c0_i32_1 = arith.constant 0 : i32
    return %arg0, %c0_i32, %c0_i32_0 : i32, i32, i32
  }
}

</mosaic_0001>

<bundles_post_ra>
// kernel: tpu_custom_call.1
= control target key start
LH: loop header
LB: loop body
LE: loop exit
PB: predicated region body
PF: predicated region fallthrough
CT: control target
= control target key end

     0   :  { %v294_v0 = vmov 0.0   ;;  %vm295_vm0 = vmmov 0   ;;  %vm30_vm1 = vcmask 130048   ;;  %vm198_vm2 = vcmask 31744   ;;  %s397_s1 = inlined_call_operand.vmem [shape: f32[16,128], index: 1, kind: input, shape index: {}]   ;;  %s398_s0 = inlined_call_operand.vmem [shape: f32[1,8,16], index: 0, kind: input, shape index: {}]   ;;  %s399_s3 = inlined_call_operand.vmem [shape: f32[128,4], index: 3, kind: input, shape index: {}]   ;;  %s400_s2 = inlined_call_operand.vmem [shape: f32[1,128], index: 2, kind: input, shape index: {}]   ;;  %s401_s4 = inlined_call_operand.vmem [shape: f32[1,4], index: 4, kind: input, shape index: {}]   ;;  %s402_s5 = inlined_call_operand.vmem [shape: f32[1,8,4], index: 5, kind: output, shape index: {}]  }
   0x1   :  { %246 = vmatprep.subr.mxu0 %v294_v0  ;;  %v22_v1 = vld [vmem:[%s397_s1 + $0x8] sm:$0xff]  ;;  %v21_v2 = vld [vmem:[%s397_s1] sm:$0xff]  ;;  %250 = vmatprep.mubr.msk.f32.mxu0 %vm295_vm0, %v294_v0  ;;  %v120_v4 = vld [vmem:[%s399_s3 + $0x78] sm:$0xff] }
   0x2   :  { %247 = vmatpush3.msra.mxu0 %v22_v1  ;;  %v20_v3 = vld [vmem:[%s398_s0] sm:$0xff]  ;;  %253 = vmatprep.subr.mxu1 %v294_v0  ;;  %v119_v5 = vld [vmem:[%s399_s3 + $0x70] sm:$0xff]  ;;  %v118_v6 = vld [vmem:[%s399_s3 + $0x68] sm:$0xff] }
   0x3   :  { %248 = vmatprep.subr.mxu0 %v294_v0  ;;  %254 = vmatpush3.msra.mxu1 %v120_v4  ;;  %v117_v7 = vld [vmem:[%s399_s3 + $0x60] sm:$0xff]  ;;  %v116_v8 = vld [vmem:[%s399_s3 + $0x58] sm:$0xff]  ;;  %v115_v9 = vld [vmem:[%s399_s3 + $0x50] sm:$0xff] }
   0x4   :  { %249 = vmatpush3.msra.mxu0 %v21_v2  ;;  %255 = vmatprep.subr.mxu1 %v294_v0  ;;  %v114_v10 = vld [vmem:[%s399_s3 + $0x48] sm:$0xff]  ;;  %v113_v11 = vld [vmem:[%s399_s3 + $0x40] sm:$0xff]  ;;  %v112_v12 = vld [vmem:[%s399_s3 + $0x38] sm:$0xff] }
   0x5   :  { %251 = vmatmul.mubr.msk.f32.vlgmr.msra.gmra.mxu0 %vm30_vm1, %v20_v3  ;;  %256 = vmatpush3.msra.mxu1 %v119_v5  ;;  %v111_v13 = vld [vmem:[%s399_s3 + $0x30] sm:$0xff]  ;;  %v110_v14 = vld [vmem:[%s399_s3 + $0x28] sm:$0xff]  ;;  %v109_v15 = vld [vmem:[%s399_s3 + $0x20] sm:$0xff] }
   0x6   :  { %257 = vmatprep.subr.mxu1 %v294_v0  ;;  %285 = vmatprep.mubr.msk.f32.mxu1 %vm295_vm0, %v294_v0  ;;  %v108_v16 = vld [vmem:[%s399_s3 + $0x18] sm:$0xff]  ;;  %v107_v17 = vld [vmem:[%s399_s3 + $0x10] sm:$0xff]  ;;  %v106_v18 = vld [vmem:[%s399_s3 + $0x8] sm:$0xff] }
   0x7   :  { %258 = vmatpush3.msra.mxu1 %v118_v6  ;;  %v105_v19 = vld [vmem:[%s399_s3] sm:$0xff] }
   0x8   :  { %259 = vmatprep.subr.mxu1 %v294_v0  ;;  %v223_v20 = vld [vmem:[%s400_s2] ss:$0 sm:$0xff] }
   0x9   :  { %260 = vmatpush3.msra.mxu1 %v117_v7  ;;  %v225_v25 = vld [vmem:[%s401_s4] ss:$0 sm:$0xff] }
   0xa   :  { %261 = vmatprep.subr.mxu1 %v294_v0 }
   0xb   :  { %262 = vmatpush3.msra.mxu1 %v116_v8 }
   0xc   :  { %263 = vmatprep.subr.mxu1 %v294_v0 }
   0xd   :  { %264 = vmatpush3.msra.mxu1 %v115_v9 }
   0xe   :  { %265 = vmatprep.subr.mxu1 %v294_v0 }
   0xf   :  { %266 = vmatpush3.msra.mxu1 %v114_v10 }
  0x10   :  { %267 = vmatprep.subr.mxu1 %v294_v0 }
  0x11   :  { %268 = vmatpush3.msra.mxu1 %v113_v11 }
  0x12   :  { %269 = vmatprep.subr.mxu1 %v294_v0 }
  0x13   :  { %270 = vmatpush3.msra.mxu1 %v112_v12 }
  0x14   :  { %271 = vmatprep.subr.mxu1 %v294_v0 }
  0x15   :  { %272 = vmatpush3.msra.mxu1 %v111_v13 }
  0x16   :  { %273 = vmatprep.subr.mxu1 %v294_v0 }
  0x17   :  { %274 = vmatpush3.msra.mxu1 %v110_v14 }
  0x18   :  { %275 = vmatprep.subr.mxu1 %v294_v0 }
  0x19   :  { %276 = vmatpush3.msra.mxu1 %v109_v15 }
  0x1a   :  { %277 = vmatprep.subr.mxu1 %v294_v0 }
  0x1b   :  { %278 = vmatpush3.msra.mxu1 %v108_v16 }
  0x1c   :  { %279 = vmatprep.subr.mxu1 %v294_v0 }
  0x1d   :  { %280 = vmatpush3.msra.mxu1 %v107_v17 }
  0x1e   :  { %281 = vmatprep.subr.mxu1 %v294_v0 }
  0x1f   :  { %282 = vmatpush3.msra.mxu1 %v106_v18 }
  0x20   :  { %283 = vmatprep.subr.mxu1 %v294_v0 }
  0x21   :  { %284 = vmatpush3.msra.mxu1 %v105_v19 }
  0xc5   :  { %v100_v21 = vpop.f32.mrf.mxu0 }
  0xc6   :  { %v101_v22 = vadd.f32 %v223_v20, %v100_v21 }
  0xc7   :  { %v252_v23 = vpop.f32.mrf.mxu0 }
  0xc8   :  { %v104_v24 = vmax.f32 %v101_v22, 0.0 }
  0xca   :  { %286 = vmatmul.mubr.f32.vlgmr.msra.gmra.mxu1 %v104_v24 }
 0x18a   :  { %v194_v26 = vpop.f32.mrf.mxu1 }
 0x18b   :  { %v195_v27 = vadd.f32 %v225_v25, %v194_v26 }
 0x18c   :  { %v287_v28 = vpop.f32.mrf.mxu1 }
 0x18d   :  { %v199_v29 = vsel %vm198_vm2, %v195_v27, -inf }
 0x18e   :  { %v200_v30 = vrot.slane %v199_v29, 4 }
 0x190   :  { %v201_v31 = vmax.f32 %v199_v29, %v200_v30 }
 0x192   :  { %v202_v32 = vrot.slane %v201_v31, 2 }
 0x194   :  { %v203_v33 = vmax.f32 %v201_v31, %v202_v32 }
 0x196   :  { %v204_v34 = vrot.slane %v203_v33, 1 }
 0x198   :  { %v205_v35 = vmax.f32 %v203_v33, %v204_v34 }
 0x19a   :  { %v206_v36 = vsub.f32 %v195_v27, %v205_v35 }
 0x19c   :  { %v207_v37 = vmul.f32 1.442695, %v206_v36 }
 0x19e   :  { %290 = vpow2.f32 %v207_v37 }
 0x1ab   :  { %v291_v38 = vpop.eup %290 }
 0x1ac   :  { %v209_v39 = vsel %vm198_vm2, %v291_v38, 0.0 }
 0x1ad   :  { %v210_v40 = vrot.slane %v209_v39, 4 }
 0x1af   :  { %v211_v41 = vadd.f32 %v210_v40, %v209_v39 }
 0x1b1   :  { %v212_v42 = vrot.slane %v211_v41, 2 }
 0x1b3   :  { %v213_v43 = vadd.f32 %v212_v42, %v211_v41 }
 0x1b5   :  { %v214_v44 = vrot.slane %v213_v43, 1 }
 0x1b7   :  { %v215_v45 = vadd.f32 %v214_v44, %v213_v43 }
 0x1b9   :  { %292 = vrcp.f32 %v215_v45 }
 0x1c6   :  { %v293_v46 = vpop.eup %292 }
 0x1c7   :  { %v217_v47 = vmul.f32 %v293_v46, %v291_v38 }
 0x1c9   :  { %218 = vst.msk [vmem:[%s402_s5] sm:$0xff] %vm198_vm2, %v217_v47 }

</bundles_post_ra>
